<compile_context>
chip_gen: v6e
topology: v6e:2x2x1
jax: 0.10.0
libtpu: 0.0.40
codegen_flags: <defaults>
</compile_context>

<pallas_src>
import functools
import math

import jax
import jax.numpy as jnp
from jax.experimental import pallas as pl
from jax.experimental.pallas import tpu as pltpu


def _round_up(x, m):
    return ((x + m - 1) // m) * m


def _gelu(x, approximate):
    if approximate:
        # tanh GELU -> EUP slot (frees the VALU); slight numerics change vs erf.
        return jax.nn.gelu(x, approximate=True)
    # Exact erf GELU == torch nn.GELU() default.
    return 0.5 * x * (1.0 + jax.lax.erf(x * (1.0 / math.sqrt(2.0))))


# ----------------------------------------------------------------------------
# Kernels
# ----------------------------------------------------------------------------
def ffn_kernel_resident(x_ref, w1_ref, b1_ref, w2_ref, b2_ref, o_ref, *,
                        approximate_gelu):
    # Weights are full-array VMEM-resident blocks (constant index maps).
    h = jnp.dot(x_ref[...], w1_ref[...], preferred_element_type=jnp.float32)
    h = _gelu(h + b1_ref[...], approximate_gelu)
    # TODO(synk): nn.Dropout(0.2) is identity in eval mode; no RNG applied here.
    o = jnp.dot(h.astype(w2_ref.dtype), w2_ref[...],
                preferred_element_type=jnp.float32)
    o_ref[...] = (o + b2_ref[...]).astype(o_ref.dtype)


def ffn_kernel_streamk(x_ref, w1_ref, b1_ref, w2_ref, b2_ref, o_ref, *scratch,
                       approximate_gelu):
    # Streamed inner-dim (grid axis 1).  For f32 outputs we accumulate directly
    # into the resident output block (no scratch); otherwise into an f32 scratch.
    acc_ref = scratch[0] if scratch else o_ref
    k = pl.program_id(1)

    @pl.when(k == 0)
    def _():
        acc_ref[...] = jnp.zeros_like(acc_ref)

    h = jnp.dot(x_ref[...], w1_ref[...], preferred_element_type=jnp.float32)
    h = _gelu(h + b1_ref[...], approximate_gelu)
    # TODO(synk): nn.Dropout(0.2) is identity in eval mode; no RNG applied here.
    acc_ref[...] += jnp.dot(h.astype(w2_ref.dtype), w2_ref[...],
                            preferred_element_type=jnp.float32)

    @pl.when(k == pl.num_programs(1) - 1)
    def _():
        o_ref[...] = (acc_ref[...] + b2_ref[...]).astype(o_ref.dtype)


# ----------------------------------------------------------------------------
# Wrapper
# ----------------------------------------------------------------------------
def _vmem_capacity_bytes():
    try:
        info = pltpu.get_tpu_info()
        cap = getattr(info, "vmem_capacity_bytes", None)
        if cap:
            return int(cap)
    except Exception:
        pass
    return 64 * 1024 * 1024   # conservative fallback (v7x per-core VMEM)


def feed_forward(x, w1, b1, w2, b2, *, tm=256, tk=512,
                 compute_dtype=None, approximate_gelu=None,
                 weights_resident=None):
    """x: [batch, seq, dim] -> [batch, seq, dim_out].

    compute_dtype: dtype fed to the MXU (e.g. jnp.bfloat16).  Weights and x are
        pre-cast in the wrapper; bias adds, GELU and accumulation stay float32.
    approximate_gelu: None -> tanh GELU iff compute_dtype is bfloat16.
    weights_resident: None -> auto (resident if weights fit the VMEM budget).
    """
    batch, seq, dim = x.shape
    inner_dim = w1.shape[1]
    dim_out = w2.shape[1]
    M = batch * seq
    out_dtype = x.dtype
    compute_dtype = jnp.dtype(x.dtype if compute_dtype is None else compute_dtype)
    if approximate_gelu is None:
        approximate_gelu = compute_dtype == jnp.dtype(jnp.bfloat16)

    w_isize = compute_dtype.itemsize
    o_isize = jnp.dtype(out_dtype).itemsize
    dim_out_pad = _round_up(dim_out, 128)      # lane-dense output stores

    # ---- budget-driven tile selection ------------------------------------
    cap = _vmem_capacity_bytes()
    budget = (cap * 3) // 4                    # headroom for internal scratch

    tm_eff = min(_round_up(tm, 8), _round_up(M, 8))
    if pl.cdiv(M, tm_eff) < 2 and M >= 16:
        # Keep >= 2 token tiles so both TensorCores get work (v7x megacore).
        tm_eff = _round_up(-(-M // 2), 8)

    def resident_bytes(tm_):
        return 2 * (tm_ * dim * w_isize
                    + dim * inner_dim * w_isize + inner_dim * 4
                    + inner_dim * dim_out_pad * w_isize + dim_out_pad * 4
                    + tm_ * dim_out_pad * o_isize)

    def streamk_bytes(tm_, tk_):
        acc = 0 if jnp.dtype(out_dtype) == jnp.dtype(jnp.float32) \
            else tm_ * dim_out_pad * 4
        return (2 * (tm_ * dim * w_isize
                     + dim * tk_ * w_isize + tk_ * 4
                     + tk_ * dim_out_pad * w_isize + dim_out_pad * 4
                     + tm_ * dim_out_pad * o_isize)
                + acc)

    use_resident = weights_resident
    if use_resident is None:
        if resident_bytes(tm_eff) <= budget:
            use_resident = True
        elif resident_bytes(8) <= budget:
            while resident_bytes(tm_eff) > budget and tm_eff > 8:
                tm_eff = max(8, _round_up(tm_eff // 2, 8))
            use_resident = True
        else:
            use_resident = False

    tk_eff = None
    if use_resident:
        inner_pad = inner_dim                  # full-array weight blocks, no pad
        footprint = resident_bytes(tm_eff)
    else:
        tk_eff = min(_round_up(tk, 128), _round_up(inner_dim, 128))
        while streamk_bytes(tm_eff, tk_eff) > budget and tk_eff > 128:
            tk_eff = max(128, _round_up(tk_eff // 2, 128))
        while streamk_bytes(tm_eff, tk_eff) > budget and tm_eff > 8:
            tm_eff = max(8, _round_up(tm_eff // 2, 8))
        inner_pad = _round_up(inner_dim, tk_eff)
        footprint = streamk_bytes(tm_eff, tk_eff)

    M_pad = _round_up(M, tm_eff)

    # ---- operand prep: pre-cast to compute_dtype, pad only when needed ----
    # Zero padding is exact: padded hidden columns give GELU(0)=0 against zero
    # rows of W2; padded output columns / token rows are sliced away below.
    x2d = x.reshape(M, dim)
    if x2d.dtype != compute_dtype:
        x2d = x2d.astype(compute_dtype)
    if M_pad != M:
        x2d = jnp.pad(x2d, ((0, M_pad - M), (0, 0)))

    w1c = w1 if w1.dtype == compute_dtype else w1.astype(compute_dtype)
    w2c = w2 if w2.dtype == compute_dtype else w2.astype(compute_dtype)
    if inner_pad != inner_dim:
        w1c = jnp.pad(w1c, ((0, 0), (0, inner_pad - inner_dim)))
        w2c = jnp.pad(w2c, ((0, inner_pad - inner_dim), (0, 0)))
    if dim_out_pad != dim_out:
        w2c = jnp.pad(w2c, ((0, 0), (0, dim_out_pad - dim_out)))

    b1p = b1.astype(jnp.float32)
    if inner_pad != inner_dim:
        b1p = jnp.pad(b1p, ((0, inner_pad - inner_dim),))
    b1p = b1p.reshape(1, inner_pad)
    b2p = b2.astype(jnp.float32)
    if dim_out_pad != dim_out:
        b2p = jnp.pad(b2p, ((0, dim_out_pad - dim_out),))
    b2p = b2p.reshape(1, dim_out_pad)

    vmem_limit = int(min(max(footprint + (8 << 20), 32 << 20), (cap * 9) // 10))

    cost = pl.CostEstimate(
        flops=2 * M * (dim * inner_dim + inner_dim * dim_out),
        transcendentals=M * inner_dim,
        bytes_accessed=(M * dim * w_isize + dim * inner_dim * w_isize
                        + inner_dim * dim_out * w_isize
                        + (inner_dim + dim_out) * 4
                        + M * dim_out * o_isize),
    )

    out_shape = jax.ShapeDtypeStruct((M_pad, dim_out_pad), out_dtype)

    if use_resident:
        kernel = functools.partial(ffn_kernel_resident,
                                   approximate_gelu=approximate_gelu)
        out2d = pl.pallas_call(
            kernel,
            out_shape=out_shape,
            grid_spec=pltpu.PrefetchScalarGridSpec(
                num_scalar_prefetch=0,
                grid=(M_pad // tm_eff,),
                in_specs=[
                    pl.BlockSpec((tm_eff, dim), lambda i: (i, 0)),          # x tile
                    pl.BlockSpec((dim, inner_pad), lambda i: (0, 0)),       # W1 (resident)
                    pl.BlockSpec((1, inner_pad), lambda i: (0, 0)),         # b1
                    pl.BlockSpec((inner_pad, dim_out_pad), lambda i: (0, 0)),  # W2 (resident)
                    pl.BlockSpec((1, dim_out_pad), lambda i: (0, 0)),       # b2
                ],
                out_specs=pl.BlockSpec((tm_eff, dim_out_pad), lambda i: (i, 0)),
            ),
            compiler_params=pltpu.CompilerParams(
                dimension_semantics=("parallel",),
                vmem_limit_bytes=vmem_limit,
            ),
            cost_estimate=cost,
        )(x2d, w1c, b1p, w2c, b2p)
    else:
        kernel = functools.partial(ffn_kernel_streamk,
                                   approximate_gelu=approximate_gelu)
        scratch = []
        if jnp.dtype(out_dtype) != jnp.dtype(jnp.float32):
            scratch = [pltpu.VMEM((tm_eff, dim_out_pad), jnp.float32)]
        out2d = pl.pallas_call(
            kernel,
            out_shape=out_shape,
            grid_spec=pltpu.PrefetchScalarGridSpec(
                num_scalar_prefetch=0,
                grid=(M_pad // tm_eff, inner_pad // tk_eff),
                in_specs=[
                    pl.BlockSpec((tm_eff, dim), lambda i, k: (i, 0)),           # x tile
                    pl.BlockSpec((dim, tk_eff), lambda i, k: (0, k)),           # W1 k-slice
                    pl.BlockSpec((1, tk_eff), lambda i, k: (0, k)),             # b1 k-slice
                    pl.BlockSpec((tk_eff, dim_out_pad), lambda i, k: (k, 0)),   # W2 k-slice
                    pl.BlockSpec((1, dim_out_pad), lambda i, k: (0, 0)),        # b2
                ],
                out_specs=pl.BlockSpec((tm_eff, dim_out_pad), lambda i, k: (i, 0)),
                scratch_shapes=scratch,
            ),
            compiler_params=pltpu.CompilerParams(
                dimension_semantics=("parallel", "arbitrary"),
                vmem_limit_bytes=vmem_limit,
            ),
            cost_estimate=cost,
        )(x2d, w1c, b1p, w2c, b2p)

    return out2d[:M, :dim_out].reshape(batch, seq, dim_out)


# ----------------------------------------------------------------------------
# Reference + demo
# ----------------------------------------------------------------------------
def _reference(x, w1, b1, w2, b2):
    b, s, d = x.shape
    x2d = x.reshape(b * s, d).astype(jnp.float32)
    h = x2d @ w1 + b1
    h = 0.5 * h * (1.0 + jax.lax.erf(h / math.sqrt(2.0)))
    o = h @ w2 + b2
    return o.reshape(b, s, w2.shape[1])


def _make_inputs(key, batch, seq, dim, mult, dim_out=None):
    inner_dim = dim * mult
    dim_out = dim if dim_out is None else dim_out
    kx, k1, k2, k3, k4 = jax.random.split(key, 5)
    lim1 = 1.0 / math.sqrt(dim)
    lim2 = 1.0 / math.sqrt(inner_dim)
    x = jax.random.normal(kx, (batch, seq, dim), dtype=jnp.float32)
    w1 = jax.random.uniform(k1, (dim, inner_dim), minval=-lim1, maxval=lim1, dtype=jnp.float32)
    b1 = jax.random.uniform(k2, (inner_dim,), minval=-lim1, maxval=lim1, dtype=jnp.float32)
    w2 = jax.random.uniform(k3, (inner_dim, dim_out), minval=-lim2, maxval=lim2, dtype=jnp.float32)
    b2 = jax.random.uniform(k4, (dim_out,), minval=-lim2, maxval=lim2, dtype=jnp.float32)
    return x, w1, b1, w2, b2


if __name__ == "__main__":
    key = jax.random.PRNGKey(0)
    k_a, k_b = jax.random.split(key)

    # Case 1: small FFN shapes implied by the module (dim=32, mult=4 -> inner=128).
    # Weight-resident path, exact erf GELU, bit-faithful f32.
    x, w1, b1, w2, b2 = _make_inputs(k_a, batch=2, seq=8, dim=32, mult=4)
    out = jax.block_until_ready(feed_forward(x, w1, b1, w2, b2))
    ref = _reference(x, w1, b1, w2, b2)
    assert out.shape == ref.shape
    assert jnp.allclose(out, ref, atol=1e-5, rtol=1e-5), "f32 resident path mismatch"

    # Same shapes with bf16 matmul inputs (pre-cast in wrapper, tanh GELU, f32 acc).
    out_bf16 = jax.block_until_ready(
        feed_forward(x, w1, b1, w2, b2, compute_dtype=jnp.bfloat16))
    assert jnp.allclose(out_bf16, ref, atol=3e-2, rtol=3e-2), "bf16 resident path mismatch"

    # Case 2: ragged token count + forced streamed-K path (4 k-tiles, f32 output
    # accumulated directly in the resident output block).
    x2, w1b, b1b, w2b, b2b = _make_inputs(k_b, batch=2, seq=10, dim=64, mult=8)
    ref2 = _reference(x2, w1b, b1b, w2b, b2b)
    out2 = jax.block_until_ready(
        feed_forward(x2, w1b, b1b, w2b, b2b, tk=128, weights_resident=False))
    assert jnp.allclose(out2, ref2, atol=1e-4, rtol=1e-4), "streamed-K f32 path mismatch"

    # Case 3: bf16 inputs + streamed-K path (exercises the f32 scratch accumulator).
    out3 = jax.block_until_ready(
        feed_forward(x2.astype(jnp.bfloat16), w1b.astype(jnp.bfloat16), b1b,
                     w2b.astype(jnp.bfloat16), b2b, tk=128, weights_resident=False))
    assert jnp.allclose(out3.astype(jnp.float32), ref2, atol=6e-2, rtol=6e-2), \
        "streamed-K bf16 path mismatch"

    # Case 4: same shapes, default auto path (weights resident, single matmul pair).
    out4 = jax.block_until_ready(feed_forward(x2, w1b, b1b, w2b, b2b))
    assert jnp.allclose(out4, ref2, atol=1e-4, rtol=1e-4), "auto resident path mismatch"

    print("KERNEL_OK")
</pallas_src>

<mosaic_0001>
module attributes {stable_mosaic.version = 11 : i64} {
  func.func @ffn_kernel_resident(%arg0: i32, %arg1: memref<8x32xf32, #tpu.memory_space<vmem>>, %arg2: memref<32x128xf32, #tpu.memory_space<vmem>>, %arg3: memref<1x128xf32, #tpu.memory_space<vmem>>, %arg4: memref<128x128xf32, #tpu.memory_space<vmem>>, %arg5: memref<1x128xf32, #tpu.memory_space<vmem>>, %arg6: memref<8x128xf32, #tpu.memory_space<vmem>>) attributes {dimension_semantics = [#tpu.dimension_semantics<parallel>], iteration_bounds = array<i64: 2>, scalar_prefetch = 0 : i64, scratch_operands = 0 : i64, tpu.core_type = #tpu.core_type<tc>, window_params = [{transform_indices = @transform_0, window_bounds = array<i64: 8, 32>}, {pipeline_mode = #tpu.pipeline_mode<synchronous>, transform_indices = @transform_1, window_bounds = array<i64: 32, 128>}, {pipeline_mode = #tpu.pipeline_mode<synchronous>, transform_indices = @transform_2, window_bounds = array<i64: 1, 128>}, {pipeline_mode = #tpu.pipeline_mode<synchronous>, transform_indices = @transform_3, window_bounds = array<i64: 128, 128>}, {pipeline_mode = #tpu.pipeline_mode<synchronous>, transform_indices = @transform_4, window_bounds = array<i64: 1, 128>}, {transform_indices = @transform_5, window_bounds = array<i64: 8, 128>}]} {
    %c0 = arith.constant 0 : index
    %c0_0 = arith.constant 0 : index
    %0 = vector.load %arg1[%c0, %c0_0] : memref<8x32xf32, #tpu.memory_space<vmem>>, vector<8x32xf32>
    %c0_1 = arith.constant 0 : index
    %c0_2 = arith.constant 0 : index
    %1 = vector.load %arg2[%c0_1, %c0_2] : memref<32x128xf32, #tpu.memory_space<vmem>>, vector<32x128xf32>
    %cst = arith.constant dense<0.000000e+00> : vector<8x128xf32>
    %2 = tpu.matmul %0, %1, %cst {dimension_numbers = #tpu.dot_dimension_numbers<[1], [0], [0], [1], [0, 0, 1, 1], [], []>} : vector<8x32xf32>, vector<32x128xf32>, vector<8x128xf32> -> vector<8x128xf32>
    %c0_3 = arith.constant 0 : index
    %c0_4 = arith.constant 0 : index
    %3 = vector.load %arg3[%c0_3, %c0_4] : memref<1x128xf32, #tpu.memory_space<vmem>>, vector<1x128xf32>
    %4 = vector.broadcast %3 : vector<1x128xf32> to vector<8x128xf32>
    %5 = arith.addf %2, %4 : vector<8x128xf32>
    %cst_5 = arith.constant 5.000000e-01 : f32
    %6 = vector.broadcast %cst_5 : f32 to vector<8x128xf32>
    %7 = arith.mulf %6, %5 : vector<8x128xf32>
    %cst_6 = arith.constant 0.707106769 : f32
    %8 = vector.broadcast %cst_6 : f32 to vector<8x128xf32>
    %9 = arith.mulf %5, %8 : vector<8x128xf32>
    %10 = math.erf %9 : vector<8x128xf32>
    %cst_7 = arith.constant 1.000000e+00 : f32
    %11 = vector.broadcast %cst_7 : f32 to vector<8x128xf32>
    %12 = arith.addf %11, %10 : vector<8x128xf32>
    %13 = arith.mulf %7, %12 : vector<8x128xf32>
    %c0_8 = arith.constant 0 : index
    %c0_9 = arith.constant 0 : index
    %14 = vector.load %arg4[%c0_8, %c0_9] : memref<128x128xf32, #tpu.memory_space<vmem>>, vector<128x128xf32>
    %cst_10 = arith.constant dense<0.000000e+00> : vector<8x128xf32>
    %15 = tpu.matmul %13, %14, %cst_10 {dimension_numbers = #tpu.dot_dimension_numbers<[1], [0], [0], [1], [0, 0, 1, 1], [], []>} : vector<8x128xf32>, vector<128x128xf32>, vector<8x128xf32> -> vector<8x128xf32>
    %c0_11 = arith.constant 0 : index
    %c0_12 = arith.constant 0 : index
    %16 = vector.load %arg5[%c0_11, %c0_12] : memref<1x128xf32, #tpu.memory_space<vmem>>, vector<1x128xf32>
    %17 = vector.broadcast %16 : vector<1x128xf32> to vector<8x128xf32>
    %18 = arith.addf %15, %17 : vector<8x128xf32>
    %c0_13 = arith.constant 0 : index
    %c0_14 = arith.constant 0 : index
    %19 = vector.load %arg6[%c0_13, %c0_14] : memref<8x128xf32, #tpu.memory_space<vmem>>, vector<8x128xf32>
    tpu.vector_store %arg6[%c0_13, %c0_14], %18 {strides = array<i32>} : memref<8x128xf32, #tpu.memory_space<vmem>>, vector<8x128xf32>,
    return
  }
  func.func @transform_0(%arg0: i32) -> (i32, i32) {
    %c0_i32 = arith.constant 0 : i32
    %c0_i32_0 = arith.constant 0 : i32
    return %arg0, %c0_i32 : i32, i32
  }
  func.func @transform_1(%arg0: i32) -> (i32, i32) {
    %c0_i32 = arith.constant 0 : i32
    %c0_i32_0 = arith.constant 0 : i32
    %c0_i32_1 = arith.constant 0 : i32
    return %c0_i32, %c0_i32_0 : i32, i32
  }
  func.func @transform_2(%arg0: i32) -> (i32, i32) {
    %c0_i32 = arith.constant 0 : i32
    %c0_i32_0 = arith.constant 0 : i32
    %c0_i32_1 = arith.constant 0 : i32
    return %c0_i32, %c0_i32_0 : i32, i32
  }
  func.func @transform_3(%arg0: i32) -> (i32, i32) {
    %c0_i32 = arith.constant 0 : i32
    %c0_i32_0 = arith.constant 0 : i32
    %c0_i32_1 = arith.constant 0 : i32
    return %c0_i32, %c0_i32_0 : i32, i32
  }
  func.func @transform_4(%arg0: i32) -> (i32, i32) {
    %c0_i32 = arith.constant 0 : i32
    %c0_i32_0 = arith.constant 0 : i32
    %c0_i32_1 = arith.constant 0 : i32
    return %c0_i32, %c0_i32_0 : i32, i32
  }
  func.func @transform_5(%arg0: i32) -> (i32, i32) {
    %c0_i32 = arith.constant 0 : i32
    %c0_i32_0 = arith.constant 0 : i32
    return %arg0, %c0_i32 : i32, i32
  }
}

</mosaic_0001>

<bundles_post_ra>
// kernel: tpu_custom_call.1
= control target key start
LH: loop header
LB: loop body
LE: loop exit
PB: predicated region body
PF: predicated region fallthrough
CT: control target
= control target key end

     0   :  { %10 = vsyncpa [#allocation3], 0  ;;  %s1108_s0 = inlined_call_operand.hbm [shape: f32[16,32], index: 0, kind: input, shape index: {}]   ;;  %s1109_s1 = inlined_call_operand.hbm [shape: f32[32,128], index: 1, kind: input, shape index: {}]   ;;  %s1110_s2 = inlined_call_operand.vmem [shape: f32[1,128], index: 2, kind: input, shape index: {}]   ;;  %s1111_s3 = inlined_call_operand.hbm [shape: f32[128,128], index: 3, kind: input, shape index: {}]   ;;  %s1112_s4 = inlined_call_operand.vmem [shape: f32[1,128], index: 4, kind: input, shape index: {}]   ;;  %s1113_s5 = inlined_call_operand.hbm [shape: f32[16,128], index: 5, kind: output, shape index: {}]  }
   0x1   :  { %12 = vsyncpa [#allocation3 + $0x1], 0 }
   0x2   :  { %13 = vsyncpa [#allocation6], 0 }
   0x3   :  { %14 = vsyncpa [#allocation4], 0 }
   0x4   :  { %16 = vsyncpa [#allocation4 + $0x1], 0  ;;  %s905_s18 = smov 0   ;;  %s907_s19 = smov 0  }
   0x5   :  { %s909_s20 = smov 0   ;;  %s911_s21 = smov 0  }
   0x6 LB: > { %s926_s22 = sadd.s32 4294967295, %s865_s21   ;;  %s557_s23 = sadd.s32 4294967294, %s865_s21   ;;  %s865_s21 = sphi %s911_s21, %s1135_s21   ;;  %s861_s20 = sphi %s909_s20, %s1134_s20   ;;  %s857_s19 = sphi %s907_s19, %s1133_s19   ;;  %s853_s18 = sphi %s905_s18, %s1132_s18  }
   0x7   : > { %p42_p0 = scmp.ne.s32.totalorder %s857_s19, %s853_s18  ;;  %p1114_p1 = scmp.eq.s32.totalorder %s926_s22, 0 }
   0x8   : > { %p156_p3 = scmp.eq.s32.totalorder %s557_s23, 1  ;;  %p558_p5 = scmp.ge.s32.totalorder %s865_s21, 1 }
   0x9   : > { %p935_p4 = por %p1114_p1, %p42_p0  ;;  %p163_p7 = scmp.lt.s32.totalorder %s865_s21, 3 }
   0xa   : > { %p940_p6 = por %p156_p3, %p42_p0  ;;  %s867_s27 = smov [#allocation5]  }
   0xb   : > { %s1118_s24 = scalar_select %p935_p4, 1, 0 }
   0xc   : > { %s1119_s25 = scalar_select %p940_p6, 1, 0 }
   0xd   : > { %p945_p8 = pnand %p558_p5, %p163_p7  ;;  %s175_s28 = sshll.u32 %s867_s27, 4  ;;  %s176_s28 = int_to_ptr.vmem [resolvable:$true] %s175_s28 }
   0xe   : > { %s868_s30 = smov [#allocation7]   ;;  %s728_s7 = scalar_lea.vmem %s176_s28, 512 }
   0xf   : > { %s1120_s26 = scalar_select %p945_p8, 1, 0 }
  0x10   : > { %p656_p9 = pneg %p945_p8  ;;  %s191_s6 = sshll.u32 %s868_s30, 4  ;;  %s192_s6 = int_to_ptr.vmem [resolvable:$true] %s191_s6 }
  0x11   : > { %p729_p13 = scmp.ne.s32.totalorder %s176_s28, %s728_s7  ;;  %p736_p5 = scmp.lt.s32.totalorder %s176_s28, %s176_s28 }
  0x12   : > { %p954_p11 = pnand %p656_p9, %p1114_p1  ;;  %p737_p7 = scmp.lt.s32.totalorder %s728_s7, %s728_s7 }
  0x14   : > { %p719_p12 = pneg %p954_p11  ;;  %p738_p10 = por %p737_p7, %p736_p5 }
  0x16   : > { %p731_p0 = pnand %p729_p13, %p719_p12 }
  0x18   : > { %p732_p3 = pneg %p731_p0 }
  0x1a   : > { %p739_p9 = pnand %p738_p10, %p732_p3 }
  0x1c   : > { %742 = shalt.err (!%p739_p9)
}
  0x1d   : > { %s869_s8 = smov 128   ;;  %s870_s9 = smov 8  }
  0x1e   : > { %659 = dma.hbm_to_vmem [thread:$0]  (!%p954_p11), %s1109_s1, 512, %s176_s28, [#allocation6], %s869_s8, %s869_s8, %s870_s9  }
  0x1f   : > { %s754_s12 = scalar_lea.vmem %s192_s6, 2048  ;;  %p762_p2 = scmp.lt.s32.totalorder %s192_s6, %s192_s6 }
  0x20   : > { %p755_p1 = scmp.ne.s32.totalorder %s192_s6, %s754_s12  ;;  %p763_p6 = scmp.lt.s32.totalorder %s754_s12, %s754_s12 }
  0x22   : > { %p757_p13 = pnand %p755_p1, %p719_p12  ;;  %p764_p5 = por %p763_p6, %p762_p2 }
  0x24   : > { %p758_p0 = pneg %p757_p13 }
  0x26   : > { %p765_p10 = pnand %p764_p5, %p758_p0 }
  0x28   : > { %768 = shalt.err (!%p765_p10)
}
  0x29   : > { %662 = dma.hbm_to_vmem [thread:$0]  (!%p954_p11), %s1111_s3, 2048, %s192_s6, [#allocation6], %s869_s8, %s869_s8, %s870_s9  }
  0x2a   : > { %s977_s15 = sadd.s32 1, %s865_s21   ;;  %s29_s16 = sadd.s32 1, %s861_s20 }
  0x2b   : > { %s26_s17 = ssub.s32 %s865_s21, %s977_s15  ;;  %p36_p1 = scmp.ne.s32.totalorder %s861_s20, %s857_s19 }
  0x2c   : > { %p27_p2 = scmp.eq.s32.totalorder %s26_s17, 0  ;;  %p37_p6 = scmp.eq.s32.totalorder %s865_s21, 0 }
  0x2d   : > { %p1122_p12 = scmp.eq.s32.totalorder %s926_s22, 1  ;;  %p673_p7 = scmp.lt.s32.totalorder %s865_s21, 2 }
  0x2e   : > { %s993_s27 = scalar_select %p27_p2, %s861_s20, %s29_s16  }
  0x2f   : > { %p987_p3 = por %p1122_p12, %p36_p1  ;;  %p38_p9 = por %p37_p6, %p36_p1 }
  0x30   : > { %s208_s28 = sand.u32 1, %s861_s20   ;;  %s563_s30 = sshll.u32 %s865_s21, 7 }
  0x31   : > { %s1123_s23 = scalar_select %p987_p3, 1, 0 }
  0x32   : > { %s562_s29 = sshll.u32 %s208_s28, 3  ;;  %s1000_s8 = scalar_lea.hbm %s1108_s0, %s563_s30 }
  0x33   : > { %s212_s9 = scalar_lea.vmem [#allocation2], %s562_s29  ;;  %p1002_p11 = pnand %p673_p7, %p38_p9 }
  0x34   : > { %s219_s10 = sshll.u32 %s212_s9, 4  ;;  %s209_s12 = scalar_lea.sflag [#allocation3], %s208_s28  ;;  %s220_s10 = int_to_ptr.vmem [resolvable:$true] %s219_s10 }
  0x35   : > { %s769_s13 = scalar_lea.hbm %s1000_s8, 128  ;;  %p771_p0 = pneg %p1002_p11 }
  0x36   : > { %p770_p13 = scmp.ne.s32.totalorder %s1000_s8, %s769_s13  ;;  %s774_s17 = scalar_lea.hbm %s1108_s0, 256 }
  0x37   : > { %p775_p1 = scmp.lt.s32.totalorder %s1000_s8, %s1108_s0  ;;  %p776_p2 = scmp.lt.s32.totalorder %s774_s17, %s769_s13 }
  0x38   : > { %p772_p5 = pnand %p771_p0, %p770_p13 }
  0x39   : > { %p777_p6 = por %p776_p2, %p775_p1 }
  0x3a   : > { %p773_p10 = pneg %p772_p5 }
  0x3c   : > { %p778_p12 = pnand %p777_p6, %p773_p10 }
  0x3e   : > { %781 = shalt.err (!%p778_p12)
}
  0x3f   : > { %s782_s6 = scalar_lea.vmem %s220_s10, 128  ;;  %s871_s28 = smov [#allocation2]  }
  0x40   : > { %p783_p7 = scmp.ne.s32.totalorder %s220_s10, %s782_s6  ;;  %s787_s7 = sshll.u32 %s871_s28, 4  ;;  %s788_s7 = int_to_ptr.vmem [resolvable:$false] %s787_s7 }
  0x41   : > { %s789_s9 = scalar_lea.vmem %s788_s7, 256  ;;  %p790_p13 = scmp.lt.s32.totalorder %s220_s10, %s788_s7 }
  0x42   : > { %p785_p9 = pnand %p783_p7, %p771_p0  ;;  %p791_p5 = scmp.lt.s32.totalorder %s789_s9, %s782_s6 }
  0x44   : > { %p786_p3 = pneg %p785_p9  ;;  %p792_p4 = por %p791_p5, %p790_p13 }
  0x46   : > { %p793_p8 = pnand %p792_p4, %p786_p3 }
  0x48   : > { %796 = shalt.err (!%p793_p8)
}
  0x49   : > { %666 = dma.hbm_to_vmem [thread:$0]  (!%p1002_p11), %s1000_s8, 128, %s220_s10, %s209_s12  }
  0x4a   : > { %p1125_p10 = scmp.ne.s32.totalorder %s1120_s26, 0 }
  0x4b   : > { %s1023_s13 = sand.u32 (!%p1125_p10), 1, %s857_s19   ;;  %p1126_p4 = scmp.ne.s32.totalorder (!%p1125_p10), %s1118_s24, 0 }
  0x4c   : > { %228 = sbr.rel (%p1125_p10) target bundleno = 518 (0x206), region = 40  ;;  %s565_s14 = sshll.u32 (!%p1125_p10), %s1023_s13, 3 }
  0x4d   : > { %s231_s16 = scalar_lea.sflag (!%p1125_p10), [#allocation3], %s1023_s13  ;;  %s234_s17 = scalar_lea.vmem (!%p1125_p10), [#allocation2], %s565_s14 }
  0x51   : > { %840 = dma.done.wait (%p1126_p4), %s231_s16, 128  }
  0x52   : > { %842 = vsyncadd (%p1126_p4), %s231_s16, 4294967168  ;;  %p1127_p8 = scmp.eq.s32.totalorder %s926_s22, 0 }
  0x54   : > { %844 = dma.done.wait (%p1127_p8), [#allocation6], 2560   ;;  %p1128_p3 = pmov %p1127_p8 }
  0x55   : > { %v872_v0 = vmov 0.0   ;;  %vm873_vm0 = vmmov 0   ;;  %v273_v1 = vld [vmem:[#allocation5 + $0x18] sm:$0xff]  ;;  %v272_v2 = vld [vmem:[#allocation5 + $0x10] sm:$0xff]  ;;  %v271_v4 = vld [vmem:[#allocation5 + $0x8] sm:$0xff]  ;;  %vm281_vm1 = vcmask 261120  }
  0x56   : > { %846 = vsyncadd (%p1128_p3), [#allocation6], 4294964736  ;;  %598 = vmatprep.subr.mxu0 %v872_v0  ;;  %606 = vmatprep.mubr.msk.f32.mxu0 %vm873_vm0, %v872_v0  ;;  %v375_v3 = vld [vmem:[#allocation7 + $0x78] sm:$0xff]  ;;  %v374_v5 = vld [vmem:[#allocation7 + $0x70] sm:$0xff]  ;;  %s573_s11 = sshll.u32 %s926_s22, 7  ;;  %s268_s12 = scalar_lea.vmem [#allocation8], %s565_s14 }
  0x57   : > { %609 = vmatprep.subr.mxu1 %v872_v0  ;;  %641 = vmatprep.mubr.msk.f32.mxu1 %vm873_vm0, %v872_v0  ;;  %v373_v6 = vld [vmem:[#allocation7 + $0x68] sm:$0xff]  ;;  %v270_v7 = vld [vmem:[#allocation5] sm:$0xff]  ;;  %v269_v8 = vld [vmem:[%s234_s17] sm:$0xff]  ;;  %s468_s30 = sshll.u32 %s268_s12, 4  ;;  %s1071_s28 = scalar_lea.hbm %s1113_s5, %s573_s11  ;;  %s469_s30 = int_to_ptr.vmem [resolvable:$true] %s468_s30 }
  0x58   : > { %599 = vmatpush3.msra.mxu0 %v273_v1  ;;  %610 = vmatpush3.msra.mxu1 %v375_v3  ;;  %v372_v9 = vld [vmem:[#allocation7 + $0x60] sm:$0xff]  ;;  %v371_v10 = vld [vmem:[#allocation7 + $0x58] sm:$0xff]  ;;  %v370_v11 = vld [vmem:[#allocation7 + $0x50] sm:$0xff]  ;;  %s455_s7 = scalar_lea.sflag [#allocation4], %s1023_s13  ;;  %s797_s9 = scalar_lea.vmem %s469_s30, 128 }
  0x59   : > { %600 = vmatprep.subr.mxu0 %v872_v0  ;;  %611 = vmatprep.subr.mxu1 %v872_v0  ;;  %v369_v12 = vld [vmem:[#allocation7 + $0x48] sm:$0xff]  ;;  %v368_v13 = vld [vmem:[#allocation7 + $0x40] sm:$0xff]  ;;  %v367_v14 = vld [vmem:[#allocation7 + $0x38] sm:$0xff]  ;;  %p798_p11 = scmp.ne.s32.totalorder %s469_s30, %s797_s9  ;;  %p1129_p0 = scmp.ne.s32.totalorder %s1123_s23, 0 }
  0x5a   : > { %601 = vmatpush3.msra.mxu0 %v272_v2  ;;  %612 = vmatpush3.msra.mxu1 %v374_v5  ;;  %v366_v15 = vld [vmem:[#allocation7 + $0x30] sm:$0xff]  ;;  %v365_v16 = vld [vmem:[#allocation7 + $0x28] sm:$0xff]  ;;  %v364_v17 = vld [vmem:[#allocation7 + $0x20] sm:$0xff]  ;;  %s874_s22 = smov [#allocation8]  }
  0x5b   : > { %602 = vmatprep.subr.mxu0 %v872_v0  ;;  %613 = vmatprep.subr.mxu1 %v872_v0  ;;  %v363_v18 = vld [vmem:[#allocation7 + $0x18] sm:$0xff]  ;;  %v362_v19 = vld [vmem:[#allocation7 + $0x10] sm:$0xff]  ;;  %v361_v20 = vld [vmem:[#allocation7 + $0x8] sm:$0xff]  ;;  %p799_p1 = pnand %p798_p11, %p1129_p0  ;;  %s801_s16 = sshll.u32 %s874_s22, 4  ;;  %s802_s16 = int_to_ptr.vmem [resolvable:$false] %s801_s16 }
  0x5c   : > { %603 = vmatpush3.msra.mxu0 %v271_v4  ;;  %614 = vmatpush3.msra.mxu1 %v373_v6  ;;  %v360_v21 = vld [vmem:[#allocation7] sm:$0xff]  ;;  %v569_v22 = vld [vmem:[%s1110_s2] ss:$0 sm:$0xff]  ;;  %s803_s14 = scalar_lea.vmem %s802_s16, 256  ;;  %p804_p6 = scmp.lt.s32.totalorder %s469_s30, %s802_s16 }
  0x5d   : > { %604 = vmatprep.subr.mxu0 %v872_v0  ;;  %615 = vmatprep.subr.mxu1 %v872_v0  ;;  %v571_v31 = vld [vmem:[%s1112_s4] ss:$0 sm:$0xff]  ;;  %p800_p2 = pneg %p799_p1  ;;  %p805_p12 = scmp.lt.s32.totalorder %s803_s14, %s797_s9 }
  0x5e   : > { %605 = vmatpush3.msra.mxu0 %v270_v7  ;;  %616 = vmatpush3.msra.mxu1 %v372_v9 }
  0x5f   : > { %607 = vmatmul.mubr.msk.f32.vlgmr.msra.gmra.mxu0 %vm281_vm1, %v269_v8  ;;  %617 = vmatprep.subr.mxu1 %v872_v0  ;;  %p806_p7 = por %p805_p12, %p804_p6 }
  0x60   : > { %618 = vmatpush3.msra.mxu1 %v371_v10 }
  0x61   : > { %619 = vmatprep.subr.mxu1 %v872_v0  ;;  %p807_p9 = pnand %p806_p7, %p800_p2 }
  0x62   : > { %620 = vmatpush3.msra.mxu1 %v370_v11 }
  0x63   : > { %621 = vmatprep.subr.mxu1 %v872_v0 }
  0x64   : > { %622 = vmatpush3.msra.mxu1 %v369_v12 }
  0x65   : > { %623 = vmatprep.subr.mxu1 %v872_v0 }
  0x66   : > { %624 = vmatpush3.msra.mxu1 %v368_v13 }
  0x67   : > { %625 = vmatprep.subr.mxu1 %v872_v0 }
  0x68   : > { %626 = vmatpush3.msra.mxu1 %v367_v14 }
  0x69   : > { %627 = vmatprep.subr.mxu1 %v872_v0 }
  0x6a   : > { %628 = vmatpush3.msra.mxu1 %v366_v15 }
  0x6b   : > { %629 = vmatprep.subr.mxu1 %v872_v0 }
  0x6c   : > { %630 = vmatpush3.msra.mxu1 %v365_v16 }
  0x6d   : > { %631 = vmatprep.subr.mxu1 %v872_v0 }
  0x6e   : > { %632 = vmatpush3.msra.mxu1 %v364_v17 }
  0x6f   : > { %633 = vmatprep.subr.mxu1 %v872_v0 }
  0x70   : > { %634 = vmatpush3.msra.mxu1 %v363_v18 }
  0x71   : > { %635 = vmatprep.subr.mxu1 %v872_v0 }
  0x72   : > { %636 = vmatpush3.msra.mxu1 %v362_v19 }
  0x73   : > { %637 = vmatprep.subr.mxu1 %v872_v0 }
  0x74   : > { %638 = vmatpush3.msra.mxu1 %v361_v20 }
  0x75   : > { %639 = vmatprep.subr.mxu1 %v872_v0 }
  0x76   : > { %640 = vmatpush3.msra.mxu1 %v360_v21 }
 0x11f   : > { %v351_v23 = vpop.f32.mrf.mxu0 }
 0x120   : > { %v352_v24 = vadd.f32 %v569_v22, %v351_v23 }
 0x121   : > { %v608_v25 = vpop.f32.mrf.mxu0 }
 0x122   : > { %v356_v26 = vmul.f32 0.70710677, %v352_v24  ;;  %v355_v28 = vmul.f32 0.5, %v352_v24 }
 0x124   : > { %715 = verf.f32 %v356_v26 }
 0x131   : > { %v716_v27 = vpop.eup %715 }
 0x132   : > { %v358_v29 = vadd.f32 1.0, %v716_v27 }
 0x134   : > { %v359_v30 = vmul.f32 %v358_v29, %v355_v28 }
 0x136   : > { %642 = vmatmul.mubr.f32.vlgmr.msra.gmra.mxu1 %v359_v30 }
 0x1f6   : > { %v449_v32 = vpop.f32.mrf.mxu1 }
 0x1f7   : > { %v450_v33 = vadd.f32 %v571_v31, %v449_v32 }
 0x1f8   : > { %v643_v34 = vpop.f32.mrf.mxu1 }
 0x1f9   : > { %453 = vst [vmem:[%s268_s12] sm:$0xff] %v450_v33 }
 0x1fa   : > { %810 = shalt.err (!%p807_p9)
}
 0x1fb   : > { %s811_s17 = scalar_lea.hbm %s1071_s28, 128  ;;  %s815_s26 = scalar_lea.hbm %s1113_s5, 256 }
 0x1fc   : > { %p812_p13 = scmp.ne.s32.totalorder %s1071_s28, %s811_s17  ;;  %p816_p4 = scmp.lt.s32.totalorder %s1071_s28, %s1113_s5 }
 0x1fd   : > { %p817_p8 = scmp.lt.s32.totalorder %s815_s26, %s811_s17 }
 0x1fe   : > { %p813_p5 = pnand %p812_p13, %p1129_p0 }
 0x1ff   : > { %p818_p3 = por %p817_p8, %p816_p4 }
 0x200   : > { %p814_p10 = pneg %p813_p5 }
 0x202   : > { %p819_p11 = pnand %p818_p3, %p814_p10 }
 0x204   : > { %822 = shalt.err (!%p819_p11)
}
 0x205   : > { %654 = dma.vmem_to_hbm [thread:$0]  (%p1129_p0), %s469_s30, 128, %s1071_s28, %s455_s7  }
 0x206 PF: > { %s480_s11 = sand.u32 1, %s853_s18   ;;  %p1130_p1 = scmp.ne.s32.totalorder %s1119_s25, 0 }
 0x207   : > { %p1131_p2 = scmp.ge.s32.totalorder %s865_s21, 2  ;;  %s481_s12 = scalar_lea.sflag [#allocation4], %s480_s11 }
 0x209   : > { %p668_p6 = pnand %p1131_p2, %p1130_p1 }
 0x20b   : > { %p669_p12 = pneg %p668_p6 }
 0x20d   : > { %848 = dma.done.wait (%p669_p12), %s481_s12, 128  }
 0x20e   : > { %850 = vsyncadd (%p669_p12), %s481_s12, 4294967168  ;;  %p19_p7 = scmp.ge.s32.totalorder %s977_s15, 4   ;;  %s1132_s18 = smov %s857_s19 }
 0x20f   : > { %s1133_s19 = smov %s861_s20  ;;  %s1134_s20 = smov %s993_s27 }
 0x210   : > { %s1135_s21 = smov %s977_s15  ;;  %21 = sbr.rel (!%p19_p7) target bundleno = 6 (0x6), region = 93 }
 0x215   :  { %486 = vsyncpa [#allocation3], 1 }
 0x216   :  { %488 = vsyncpa [#allocation3 + $0x1], 1 }
 0x217   :  { %489 = vsyncpa [#allocation6], 1 }
 0x218   :  { %490 = vsyncpa [#allocation4], 1 }
 0x219   :  { %492 = vsyncpa [#allocation4 + $0x1], 1 }

</bundles_post_ra>
